<compile_context>
chip_gen: v6e
topology: v6e:2x2x1
jax: 0.10.0
libtpu: 0.0.40
codegen_flags: <defaults>
</compile_context>

<pallas_src>
import functools

import jax
import jax.numpy as jnp
from jax.experimental import pallas as pl
from jax.experimental.pallas import tpu as pltpu


# ----------------------------------------------------------------------------
# Kernel: Bt meshes per grid step, fully fused: GC1 -> GC2 -> + skip.
# ----------------------------------------------------------------------------
def _res_graph_conv_kernel(x_ref, a_ref, *rest,
                           doutp, has_skip_proj, reassoc_layer1):
    idx = 0
    deg_ref = None
    if reassoc_layer1:
        deg_ref = rest[idx]; idx += 1
    wa_ref = rest[idx]; idx += 1          # (Dinp, 2*Doutp) = [W0a | W1a]
    wb_ref = rest[idx]; idx += 1          # (Doutp, 2*Doutp) = [W0b | W1b]
    ws_ref = None
    if has_skip_proj:
        ws_ref = rest[idx]; idx += 1      # (Dinp, Doutp)
    bias_ref = rest[idx]; idx += 1        # (8, Doutp): rows b0a,b1a,b0b,b1b[,bs]
    out_ref = rest[idx]                   # (Bt, Vp, Doutp)

    bt, vp, dinp = x_ref.shape
    rows = bt * vp

    # relu(x): PyTorch uses F.relu(x, inplace=True) so the skip path also sees
    # the rectified activations.
    xr = jnp.maximum(x_ref[...].reshape(rows, dinp), 0.0)     # (rows, Dinp) f32
    A = a_ref[...]                                            # (Bt, Vp, Vp) bf16, exact ints

    biases = bias_ref[...]                                    # (8, Doutp) f32
    b0a = biases[0:1, :]
    b1a = biases[1:2, :]
    b0b = biases[2:3, :]
    b1b = biases[3:4, :]

    # ---- graph_conv1(relu(x), edge) ----
    if reassoc_layer1:
        # A @ (xr @ W1 + b1) == (A @ xr) @ W1 + deg * b1  (cheaper when Dinp < Doutp)
        wa = wa_ref[...]
        w0a = wa[:, :doutp]
        w1a = wa[:, doutp:]
        v0 = jnp.dot(xr, w0a, preferred_element_type=jnp.float32) + b0a
        agg = jnp.einsum('bij,bjd->bid', A,
                         xr.reshape(bt, vp, dinp).astype(jnp.bfloat16),
                         preferred_element_type=jnp.float32).reshape(rows, dinp)
        deg = deg_ref[...].reshape(rows, 1)                   # precomputed on host
        h1 = v0 + jnp.dot(agg, w1a, preferred_element_type=jnp.float32) + deg * b1a
    else:
        # One packed matmul gives both xr@W0 and xr@W1.
        va = jnp.dot(xr, wa_ref[...], preferred_element_type=jnp.float32)  # (rows, 2*Doutp)
        v1 = (va[:, doutp:] + b1a).reshape(bt, vp, doutp).astype(jnp.bfloat16)
        h1 = (va[:, :doutp] + b0a) + jnp.einsum(
            'bij,bjd->bid', A, v1,
            preferred_element_type=jnp.float32).reshape(rows, doutp)

    # ---- graph_conv2(relu(h1), edge) ----
    h1r = jnp.maximum(h1, 0.0)
    ub = jnp.dot(h1r, wb_ref[...], preferred_element_type=jnp.float32)     # (rows, 2*Doutp)
    u1 = (ub[:, doutp:] + b1b).reshape(bt, vp, doutp).astype(jnp.bfloat16)
    h2 = (ub[:, :doutp] + b0b) + jnp.einsum(
        'bij,bjd->bid', A, u1,
        preferred_element_type=jnp.float32).reshape(rows, doutp)

    # ---- skip connection (on relu(x), see note above) ----
    if has_skip_proj:
        bs = biases[4:5, :]
        skip = jnp.dot(xr, ws_ref[...], preferred_element_type=jnp.float32) + bs
    else:
        skip = xr                        # Dinp == Doutp here: pure identity add
    out_ref[...] = (h2 + skip).reshape(bt, vp, doutp).astype(out_ref.dtype)


# ----------------------------------------------------------------------------
# Plain-JAX glue
# ----------------------------------------------------------------------------
def _round_up(n, m):
    return ((n + m - 1) // m) * m


def precompute_mesh_topology(edges, num_meshes, verts_per_mesh, directed=False):
    """(B*E, 2) global-index edge list -> ((B, V, V) f32 adjacency, (B, V, 1) f32 degrees).

    Edges never cross meshes (packed per-mesh edge convention of the mesh head),
    so the adjacency is block-diagonal and stored per mesh.  Build once per
    topology and reuse across every ResGraphConv layer."""
    b_idx = edges[:, 0] // verts_per_mesh
    u = edges[:, 0] % verts_per_mesh
    v = edges[:, 1] % verts_per_mesh
    A = jnp.zeros((num_meshes, verts_per_mesh, verts_per_mesh), jnp.float32)
    A = A.at[b_idx, u, v].add(1.0)
    if not directed:
        A = A.at[b_idx, v, u].add(1.0)
    deg = jnp.sum(A, axis=-1, keepdims=True)
    return A, deg


def _choose_mesh_tile(num_meshes, vp, dinp, doutp, budget_bytes=24 * 1024 * 1024):
    """Meshes per grid step: fill ~256 MXU rows, stay inside a VMEM budget."""
    stream = vp * dinp * 4 + vp * vp * 2 + vp * 4 + vp * doutp * 4   # per-mesh streamed bytes
    temps = vp * (4 * doutp + dinp) * 4                              # rough f32 temporaries
    per_mesh = 2 * stream + temps                                    # x2: double-buffered stream
    bt_vmem = max(1, budget_bytes // max(per_mesh, 1))
    bt_mxu = max(1, -(-256 // vp))                                   # ceil(256 / Vp)
    return max(1, min(num_meshes, bt_mxu, bt_vmem))


def _vmem_limit_bytes():
    """~3/4 of this chip's physical VMEM (≈48 MiB on v7x, 96 MiB on v5e/v6e)."""
    try:
        cap = pltpu.get_tpu_info().vmem_capacity_bytes
    except Exception:
        cap = 64 * 1024 * 1024
    return int(min(cap * 3 // 4, 96 * 1024 * 1024))


def res_graph_conv(x, edges, params, *, num_meshes, directed=False, topology=None):
    """x: (B*V, Din) f32, edges: (B*E, 2) int32 global vertex ids. -> (B*V, Dout)."""
    N, Din = x.shape
    B = num_meshes
    assert N % B == 0, "packed vertex count must be divisible by num_meshes"
    V = N // B
    Dout = params["w0a"].shape[1]

    has_skip = Din != Dout
    if has_skip and params.get("ws") is None:
        raise ValueError("input_dim != output_dim requires skip-projection params 'ws'/'bs'")

    Vp = _round_up(V, 16)            # bf16 sublane-friendly
    Dinp = _round_up(Din, 128)       # lane-dense
    Doutp = _round_up(Dout, 128)     # lane-dense output stores
    reassoc = Dinp < Doutp           # layer-1 A-contraction cheaper on Din side

    if topology is None:
        topology = precompute_mesh_topology(edges, B, V, directed=directed)
    A_f32, deg = topology

    Bt = _choose_mesh_tile(B, Vp, Dinp, Doutp)
    Bp = _round_up(B, Bt)

    # ---- pad operands (zero padding is semantically inert; padded rows/meshes
    #      are sliced off, padded A rows/cols are zero so they never leak). ----
    xb = jnp.pad(x.reshape(B, V, Din), ((0, Bp - B), (0, Vp - V), (0, Dinp - Din)))
    # bf16 adjacency is exact while per-entry multiplicities/degrees stay < 256.
    A = jnp.pad(A_f32, ((0, Bp - B), (0, Vp - V), (0, Vp - V))).astype(jnp.bfloat16)
    degp = jnp.pad(deg, ((0, Bp - B), (0, Vp - V), (0, 0)))

    def pad_w(w, din, dout):
        return jnp.pad(w, ((0, din - w.shape[0]), (0, dout - w.shape[1])))

    def pad_b(b, dout):
        return jnp.pad(b, ((0, 0), (0, dout - b.shape[1])))

    wa = jnp.concatenate([pad_w(params["w0a"], Dinp, Doutp),
                          pad_w(params["w1a"], Dinp, Doutp)], axis=1)     # (Dinp, 2*Doutp)
    wb = jnp.concatenate([pad_w(params["w0b"], Doutp, Doutp),
                          pad_w(params["w1b"], Doutp, Doutp)], axis=1)    # (Doutp, 2*Doutp)
    bias_rows = [params["b0a"], params["b1a"], params["b0b"], params["b1b"]]
    if has_skip:
        bias_rows.append(params["bs"])
    biases = jnp.concatenate([pad_b(b, Doutp) for b in bias_rows], axis=0)
    biases = jnp.pad(biases, ((0, 8 - biases.shape[0]), (0, 0)))          # (8, Doutp)

    # ---- BlockSpecs: grid over mesh tiles; weights/biases resident ----
    def mesh_spec(rows, cols):
        return pl.BlockSpec((Bt, rows, cols), lambda g: (g, 0, 0))

    def const_spec(rows, cols):
        return pl.BlockSpec((rows, cols), lambda g: (0, 0))

    operands = [xb, A]
    in_specs = [mesh_spec(Vp, Dinp), mesh_spec(Vp, Vp)]
    if reassoc:
        operands.append(degp)
        in_specs.append(mesh_spec(Vp, 1))
    operands += [wa, wb]
    in_specs += [const_spec(Dinp, 2 * Doutp), const_spec(Doutp, 2 * Doutp)]
    if has_skip:
        operands.append(pad_w(params["ws"], Dinp, Doutp))
        in_specs.append(const_spec(Dinp, Doutp))
    operands.append(biases)
    in_specs.append(const_spec(8, Doutp))

    kernel = functools.partial(_res_graph_conv_kernel,
                               doutp=Doutp,
                               has_skip_proj=has_skip,
                               reassoc_layer1=reassoc)

    out_padded = pl.pallas_call(
        kernel,
        out_shape=jax.ShapeDtypeStruct((Bp, Vp, Doutp), x.dtype),
        grid=(Bp // Bt,),
        in_specs=in_specs,
        out_specs=pl.BlockSpec((Bt, Vp, Doutp), lambda g: (g, 0, 0)),
        compiler_params=pltpu.CompilerParams(
            dimension_semantics=("parallel",),          # megacore-friendly on v7x
            vmem_limit_bytes=_vmem_limit_bytes(),
        ),
    )(*operands)

    return out_padded[:B, :V, :Dout].reshape(B * V, Dout)


# ----------------------------------------------------------------------------
# Pure-JAX reference (mirrors the PyTorch forward, incl. the inplace-relu skip)
# ----------------------------------------------------------------------------
def _edges_to_dense_adjacency(edges, num_verts, directed=False, dtype=jnp.float32):
    A = jnp.zeros((num_verts, num_verts), dtype)
    A = A.at[edges[:, 0], edges[:, 1]].add(1.0)
    if not directed:
        A = A.at[edges[:, 1], edges[:, 0]].add(1.0)
    return A


def _reference(x, edges, params, *, directed=False):
    N, Din = x.shape
    Dout = params["w0a"].shape[1]
    A = _edges_to_dense_adjacency(edges, N, directed=directed, dtype=x.dtype)

    def gc(inp, w0, b0, w1, b1):
        return (inp @ w0 + b0) + A @ (inp @ w1 + b1)

    xr = jax.nn.relu(x)   # F.relu(x, inplace=True) mutates x -> skip sees relu(x)
    h1 = gc(xr, params["w0a"], params["b0a"], params["w1a"], params["b1a"])
    h2 = gc(jax.nn.relu(h1), params["w0b"], params["b0b"], params["w1b"], params["b1b"])
    if Din == Dout:
        skip = xr
    else:
        skip = xr @ params["ws"] + params["bs"]
    return h2 + skip


def init_params(key, input_dim, output_dim):
    """Deterministic synthetic parameters (normal init, like gconv_init='normal')."""
    ks = jax.random.split(key, 6)

    def lin(k, din, dout, scale=0.1):
        kw, kb = jax.random.split(k)
        w = scale * jax.random.normal(kw, (din, dout), jnp.float32)
        b = scale * jax.random.normal(kb, (1, dout), jnp.float32)
        return w, b

    w0a, b0a = lin(ks[0], input_dim, output_dim)
    w1a, b1a = lin(ks[1], input_dim, output_dim)
    w0b, b0b = lin(ks[2], output_dim, output_dim)
    w1b, b1b = lin(ks[3], output_dim, output_dim)
    params = dict(w0a=w0a, b0a=b0a, w1a=w1a, b1a=b1a,
                  w0b=w0b, b0b=b0b, w1b=w1b, b1b=b1b)
    if input_dim != output_dim:
        ws, bs = lin(ks[4], input_dim, output_dim)
        params["ws"], params["bs"] = ws, bs
    else:
        params["ws"] = None
        params["bs"] = None
    return params


if __name__ == "__main__":
    key = jax.random.PRNGKey(0)

    B, V = 2, 8                 # 2 meshes, 8 verts each -> N = 16 packed vertices
    N = B * V

    # Ring edges within each mesh, packed (global) vertex indices -> (B*E, 2).
    edge_list = []
    for b in range(B):
        off = b * V
        for v in range(V):
            edge_list.append((off + v, off + (v + 1) % V))
    edges = jnp.asarray(edge_list, dtype=jnp.int32)

    # Topology (adjacency + degrees) built once and reused across layers/configs.
    topo = precompute_mesh_topology(edges, B, V, directed=False)

    # Exercise: skip-projection path, identity-skip path, and layer-1 reassoc path.
    configs = [(8, 32), (32, 32), (3, 256)]
    for i, (din, dout) in enumerate(configs):
        k_x, k_p = jax.random.split(jax.random.fold_in(key, i))
        x = jax.random.normal(k_x, (N, din), jnp.float32)
        params = init_params(k_p, din, dout)

        out = res_graph_conv(x, edges, params, num_meshes=B, directed=False,
                             topology=topo)
        jax.block_until_ready(out)

        ref = _reference(x, edges, params, directed=False)
        assert out.shape == (N, dout)
        # Only precision loss vs the f32 reference is the bf16 cast of the dense
        # operand in the A-contractions (A itself is exact in bf16).
        assert jnp.allclose(out, ref, atol=1e-2, rtol=1e-2), \
            f"mismatch vs pure-JAX reference for (Din, Dout)={(din, dout)}"

    print("KERNEL_OK")
</pallas_src>

<mosaic_0001>
module attributes {stable_mosaic.version = 11 : i64} {
  func.func @_res_graph_conv_kernel(%arg0: i32, %arg1: memref<2x16x128xf32, #tpu.memory_space<vmem>>, %arg2: memref<2x16x16xbf16, #tpu.memory_space<vmem>>, %arg3: memref<128x256xf32, #tpu.memory_space<vmem>>, %arg4: memref<128x256xf32, #tpu.memory_space<vmem>>, %arg5: memref<128x128xf32, #tpu.memory_space<vmem>>, %arg6: memref<8x128xf32, #tpu.memory_space<vmem>>, %arg7: memref<2x16x128xf32, #tpu.memory_space<vmem>>) attributes {dimension_semantics = [#tpu.dimension_semantics<parallel>], iteration_bounds = array<i64: 1>, scalar_prefetch = 0 : i64, scratch_operands = 0 : i64, tpu.core_type = #tpu.core_type<tc>, window_params = [{transform_indices = @transform_0, window_bounds = array<i64: 2, 16, 128>}, {transform_indices = @transform_1, window_bounds = array<i64: 2, 16, 16>}, {pipeline_mode = #tpu.pipeline_mode<synchronous>, transform_indices = @transform_2, window_bounds = array<i64: 128, 256>}, {pipeline_mode = #tpu.pipeline_mode<synchronous>, transform_indices = @transform_3, window_bounds = array<i64: 128, 256>}, {pipeline_mode = #tpu.pipeline_mode<synchronous>, transform_indices = @transform_4, window_bounds = array<i64: 128, 128>}, {pipeline_mode = #tpu.pipeline_mode<synchronous>, transform_indices = @transform_5, window_bounds = array<i64: 8, 128>}, {transform_indices = @transform_6, window_bounds = array<i64: 2, 16, 128>}]} {
    %c0 = arith.constant 0 : index
    %c0_0 = arith.constant 0 : index
    %c0_1 = arith.constant 0 : index
    %0 = vector.load %arg1[%c0, %c0_0, %c0_1] : memref<2x16x128xf32, #tpu.memory_space<vmem>>, vector<2x16x128xf32>
    %1 = vector.shape_cast %0 : vector<2x16x128xf32> to vector<32x128xf32>
    %cst = arith.constant 0.000000e+00 : f32
    %2 = vector.broadcast %cst : f32 to vector<32x128xf32>
    %3 = arith.maximumf %1, %2 : vector<32x128xf32>
    %c0_2 = arith.constant 0 : index
    %c0_3 = arith.constant 0 : index
    %c0_4 = arith.constant 0 : index
    %4 = vector.load %arg2[%c0_2, %c0_3, %c0_4] : memref<2x16x16xbf16, #tpu.memory_space<vmem>>, vector<2x16x16xbf16>
    %c0_5 = arith.constant 0 : index
    %c0_6 = arith.constant 0 : index
    %5 = vector.load %arg6[%c0_5, %c0_6] : memref<8x128xf32, #tpu.memory_space<vmem>>, vector<8x128xf32>
    %6 = vector.extract_strided_slice %5 {offsets = [0, 0], sizes = [1, 128], strides = [1, 1]} : vector<8x128xf32> to vector<1x128xf32>
    %7 = vector.extract_strided_slice %5 {offsets = [1, 0], sizes = [1, 128], strides = [1, 1]} : vector<8x128xf32> to vector<1x128xf32>
    %8 = vector.extract_strided_slice %5 {offsets = [2, 0], sizes = [1, 128], strides = [1, 1]} : vector<8x128xf32> to vector<1x128xf32>
    %9 = vector.extract_strided_slice %5 {offsets = [3, 0], sizes = [1, 128], strides = [1, 1]} : vector<8x128xf32> to vector<1x128xf32>
    %c0_7 = arith.constant 0 : index
    %c0_8 = arith.constant 0 : index
    %10 = vector.load %arg3[%c0_7, %c0_8] : memref<128x256xf32, #tpu.memory_space<vmem>>, vector<128x256xf32>
    %cst_9 = arith.constant dense<0.000000e+00> : vector<32x256xf32>
    %11 = tpu.matmul %3, %10, %cst_9 {dimension_numbers = #tpu.dot_dimension_numbers<[1], [0], [0], [1], [0, 0, 1, 1], [], []>} : vector<32x128xf32>, vector<128x256xf32>, vector<32x256xf32> -> vector<32x256xf32>
    %12 = vector.extract_strided_slice %11 {offsets = [0, 128], sizes = [32, 128], strides = [1, 1]} : vector<32x256xf32> to vector<32x128xf32>
    %13 = vector.broadcast %7 : vector<1x128xf32> to vector<32x128xf32>
    %14 = arith.addf %12, %13 : vector<32x128xf32>
    %15 = vector.shape_cast %14 : vector<32x128xf32> to vector<2x16x128xf32>
    %16 = arith.truncf %15 : vector<2x16x128xf32> to vector<2x16x128xbf16>
    %17 = vector.extract_strided_slice %11 {offsets = [0, 0], sizes = [32, 128], strides = [1, 1]} : vector<32x256xf32> to vector<32x128xf32>
    %18 = vector.broadcast %6 : vector<1x128xf32> to vector<32x128xf32>
    %19 = arith.addf %17, %18 : vector<32x128xf32>
    "tpu.trace_start"() <{level = 10 : i32, message = "bij,bjd->bid"}> : () -> ()
    %cst_10 = arith.constant dense<0.000000e+00> : vector<2x16x128xf32>
    %20 = tpu.matmul %4, %16, %cst_10 {dimension_numbers = #tpu.dot_dimension_numbers<[2], [1], [1], [2], [0, 0, 0, 1, 1, 2], [0], [0]>} : vector<2x16x16xbf16>, vector<2x16x128xbf16>, vector<2x16x128xf32> -> vector<2x16x128xf32>
    "tpu.trace_stop"() : () -> ()
    %21 = vector.shape_cast %20 : vector<2x16x128xf32> to vector<32x128xf32>
    %22 = arith.addf %19, %21 : vector<32x128xf32>
    %cst_11 = arith.constant 0.000000e+00 : f32
    %23 = vector.broadcast %cst_11 : f32 to vector<32x128xf32>
    %24 = arith.maximumf %22, %23 : vector<32x128xf32>
    %c0_12 = arith.constant 0 : index
    %c0_13 = arith.constant 0 : index
    %25 = vector.load %arg4[%c0_12, %c0_13] : memref<128x256xf32, #tpu.memory_space<vmem>>, vector<128x256xf32>
    %cst_14 = arith.constant dense<0.000000e+00> : vector<32x256xf32>
    %26 = tpu.matmul %24, %25, %cst_14 {dimension_numbers = #tpu.dot_dimension_numbers<[1], [0], [0], [1], [0, 0, 1, 1], [], []>} : vector<32x128xf32>, vector<128x256xf32>, vector<32x256xf32> -> vector<32x256xf32>
    %27 = vector.extract_strided_slice %26 {offsets = [0, 128], sizes = [32, 128], strides = [1, 1]} : vector<32x256xf32> to vector<32x128xf32>
    %28 = vector.broadcast %9 : vector<1x128xf32> to vector<32x128xf32>
    %29 = arith.addf %27, %28 : vector<32x128xf32>
    %30 = vector.shape_cast %29 : vector<32x128xf32> to vector<2x16x128xf32>
    %31 = arith.truncf %30 : vector<2x16x128xf32> to vector<2x16x128xbf16>
    %32 = vector.extract_strided_slice %26 {offsets = [0, 0], sizes = [32, 128], strides = [1, 1]} : vector<32x256xf32> to vector<32x128xf32>
    %33 = vector.broadcast %8 : vector<1x128xf32> to vector<32x128xf32>
    %34 = arith.addf %32, %33 : vector<32x128xf32>
    "tpu.trace_start"() <{level = 10 : i32, message = "bij,bjd->bid"}> : () -> ()
    %cst_15 = arith.constant dense<0.000000e+00> : vector<2x16x128xf32>
    %35 = tpu.matmul %4, %31, %cst_15 {dimension_numbers = #tpu.dot_dimension_numbers<[2], [1], [1], [2], [0, 0, 0, 1, 1, 2], [0], [0]>} : vector<2x16x16xbf16>, vector<2x16x128xbf16>, vector<2x16x128xf32> -> vector<2x16x128xf32>
    "tpu.trace_stop"() : () -> ()
    %36 = vector.shape_cast %35 : vector<2x16x128xf32> to vector<32x128xf32>
    %37 = arith.addf %34, %36 : vector<32x128xf32>
    %38 = vector.extract_strided_slice %5 {offsets = [4, 0], sizes = [1, 128], strides = [1, 1]} : vector<8x128xf32> to vector<1x128xf32>
    %c0_16 = arith.constant 0 : index
    %c0_17 = arith.constant 0 : index
    %39 = vector.load %arg5[%c0_16, %c0_17] : memref<128x128xf32, #tpu.memory_space<vmem>>, vector<128x128xf32>
    %cst_18 = arith.constant dense<0.000000e+00> : vector<32x128xf32>
    %40 = tpu.matmul %3, %39, %cst_18 {dimension_numbers = #tpu.dot_dimension_numbers<[1], [0], [0], [1], [0, 0, 1, 1], [], []>} : vector<32x128xf32>, vector<128x128xf32>, vector<32x128xf32> -> vector<32x128xf32>
    %41 = vector.broadcast %38 : vector<1x128xf32> to vector<32x128xf32>
    %42 = arith.addf %40, %41 : vector<32x128xf32>
    %43 = arith.addf %37, %42 : vector<32x128xf32>
    %44 = vector.shape_cast %43 : vector<32x128xf32> to vector<2x16x128xf32>
    %c0_19 = arith.constant 0 : index
    %c0_20 = arith.constant 0 : index
    %c0_21 = arith.constant 0 : index
    %45 = vector.load %arg7[%c0_19, %c0_20, %c0_21] : memref<2x16x128xf32, #tpu.memory_space<vmem>>, vector<2x16x128xf32>
    tpu.vector_store %arg7[%c0_19, %c0_20, %c0_21], %44 {strides = array<i32>} : memref<2x16x128xf32, #tpu.memory_space<vmem>>, vector<2x16x128xf32>,
    return
  }
  func.func @transform_0(%arg0: i32) -> (i32, i32, i32) {
    %c0_i32 = arith.constant 0 : i32
    %c0_i32_0 = arith.constant 0 : i32
    %c0_i32_1 = arith.constant 0 : i32
    return %arg0, %c0_i32, %c0_i32_0 : i32, i32, i32
  }
  func.func @transform_1(%arg0: i32) -> (i32, i32, i32) {
    %c0_i32 = arith.constant 0 : i32
    %c0_i32_0 = arith.constant 0 : i32
    %c0_i32_1 = arith.constant 0 : i32
    return %arg0, %c0_i32, %c0_i32_0 : i32, i32, i32
  }
  func.func @transform_2(%arg0: i32) -> (i32, i32) {
    %c0_i32 = arith.constant 0 : i32
    %c0_i32_0 = arith.constant 0 : i32
    %c0_i32_1 = arith.constant 0 : i32
    return %c0_i32, %c0_i32_0 : i32, i32
  }
  func.func @transform_3(%arg0: i32) -> (i32, i32) {
    %c0_i32 = arith.constant 0 : i32
    %c0_i32_0 = arith.constant 0 : i32
    %c0_i32_1 = arith.constant 0 : i32
    return %c0_i32, %c0_i32_0 : i32, i32
  }
  func.func @transform_4(%arg0: i32) -> (i32, i32) {
    %c0_i32 = arith.constant 0 : i32
    %c0_i32_0 = arith.constant 0 : i32
    %c0_i32_1 = arith.constant 0 : i32
    return %c0_i32, %c0_i32_0 : i32, i32
  }
  func.func @transform_5(%arg0: i32) -> (i32, i32) {
    %c0_i32 = arith.constant 0 : i32
    %c0_i32_0 = arith.constant 0 : i32
    %c0_i32_1 = arith.constant 0 : i32
    return %c0_i32, %c0_i32_0 : i32, i32
  }
  func.func @transform_6(%arg0: i32) -> (i32, i32, i32) {
    %c0_i32 = arith.constant 0 : i32
    %c0_i32_0 = arith.constant 0 : i32
    %c0_i32_1 = arith.constant 0 : i32
    return %arg0, %c0_i32, %c0_i32_0 : i32, i32, i32
  }
}

</mosaic_0001>

<bundles_post_ra>
// kernel: tpu_custom_call.1
= control target key start
LH: loop header
LB: loop body
LE: loop exit
PB: predicated region body
PF: predicated region fallthrough
CT: control target
= control target key end

     0   :  { %11 = vsyncpa [#allocation3], 0  ;;  %s1114_s0 = inlined_call_operand.hbm [shape: f32[2,16,128], index: 0, kind: input, shape index: {}]   ;;  %s1115_s1 = inlined_call_operand.hbm [shape: bf16[2,16,16], index: 1, kind: input, shape index: {}]   ;;  %s1116_s2 = inlined_call_operand.hbm [shape: f32[128,256], index: 2, kind: input, shape index: {}]   ;;  %s1117_s3 = inlined_call_operand.hbm [shape: f32[128,256], index: 3, kind: input, shape index: {}]   ;;  %s1118_s4 = inlined_call_operand.hbm [shape: f32[128,128], index: 4, kind: input, shape index: {}]   ;;  %s1119_s5 = inlined_call_operand.vmem [shape: f32[8,128], index: 5, kind: input, shape index: {}]   ;;  %s1120_s6 = inlined_call_operand.hbm [shape: f32[2,16,128], index: 6, kind: output, shape index: {}]  }
   0x1   :  { %12 = vsyncpa [#allocation6], 0 }
   0x2   :  { %13 = vsyncpa [#allocation9], 0 }
   0x3   :  { %14 = vsyncpa [#allocation4], 0  ;;  %s949_s21 = smov [#allocation5]  }
   0x4   :  { %s32_s22 = sshll.u32 %s949_s21, 4  ;;  %s33_s22 = int_to_ptr.vmem [resolvable:$true] %s32_s22 }
   0x5   :  { %s829_s23 = scalar_lea.vmem %s33_s22, 256  ;;  %p834_p1 = scmp.lt.s32.totalorder %s33_s22, %s33_s22 }
   0x6   :  { %p830_p0 = scmp.ne.s32.totalorder %s33_s22, %s829_s23  ;;  %p835_p2 = scmp.lt.s32.totalorder %s829_s23, %s829_s23 }
   0x8   :  { %p836_p3 = por %p835_p2, %p834_p1 }
   0xa   :  { %p837_p4 = pnand %p836_p3, %p830_p0 }
   0xc   :  { %840 = shalt.err (!%p837_p4)
}
   0xd   :  { %s950_s24 = smov 64   ;;  %s951_s25 = smov 4  }
   0xe   :  { %38 = dma.hbm_to_vmem [thread:$0]  %s1115_s1, 256, %s33_s22, [#allocation6], %s950_s24, %s950_s24, %s951_s25  }
   0xf   :  { %s952_s28 = smov [#allocation8]   ;;  %s953_s30 = smov [#allocation2]  }
  0x10   :  { %s56_s29 = sshll.u32 %s952_s28, 4  ;;  %s20_s7 = sshll.u32 %s953_s30, 4  ;;  %s57_s29 = int_to_ptr.vmem [resolvable:$true] %s56_s29  ;;  %s21_s7 = int_to_ptr.vmem [resolvable:$true] %s20_s7 }
  0x11   :  { %s849_s8 = scalar_lea.vmem %s57_s29, 4096  ;;  %p854_p6 = scmp.lt.s32.totalorder %s57_s29, %s57_s29 }
  0x12   :  { %p850_p5 = scmp.ne.s32.totalorder %s57_s29, %s849_s8  ;;  %p855_p7 = scmp.lt.s32.totalorder %s849_s8, %s849_s8 }
  0x14   :  { %p856_p8 = por %p855_p7, %p854_p6 }
  0x16   :  { %p857_p9 = pnand %p856_p8, %p850_p5 }
  0x18   :  { %860 = shalt.err (!%p857_p9)
}
  0x19   :  { %s954_s9 = smov 256   ;;  %s955_s10 = smov 16  }
  0x1a   :  { %62 = dma.hbm_to_vmem [thread:$0]  %s1117_s3, 4096, %s57_s29, [#allocation9], %s954_s9, %s954_s9, %s955_s10  }
  0x1b   :  { %s869_s1 = scalar_lea.vmem %s21_s7, 512  ;;  %p874_p11 = scmp.lt.s32.totalorder %s21_s7, %s21_s7 }
  0x1c   :  { %p870_p10 = scmp.ne.s32.totalorder %s21_s7, %s869_s1  ;;  %p875_p12 = scmp.lt.s32.totalorder %s869_s1, %s869_s1 }
  0x1e   :  { %p876_p13 = por %p875_p12, %p874_p11 }
  0x20   :  { %p877_p0 = pnand %p876_p13, %p870_p10 }
  0x22   :  { %880 = shalt.err (!%p877_p0)
}
  0x23   :  { %s956_s13 = smov 128   ;;  %s957_s14 = smov 8  }
  0x24   :  { %26 = dma.hbm_to_vmem [thread:$0]  %s1114_s0, 512, %s21_s7, [#allocation3], %s956_s13, %s956_s13, %s957_s14  }
  0x25   :  { %s958_s17 = smov [#allocation7]   ;;  %s959_s3 = smov [#allocation10]  }
  0x26   :  { %s44_s18 = sshll.u32 %s958_s17, 4  ;;  %s68_s19 = sshll.u32 %s959_s3, 4  ;;  %s45_s18 = int_to_ptr.vmem [resolvable:$true] %s44_s18  ;;  %s69_s19 = int_to_ptr.vmem [resolvable:$true] %s68_s19 }
  0x27   :  { %s889_s20 = scalar_lea.vmem %s45_s18, 4096  ;;  %p894_p2 = scmp.lt.s32.totalorder %s45_s18, %s45_s18 }
  0x28   :  { %p890_p1 = scmp.ne.s32.totalorder %s45_s18, %s889_s20  ;;  %p895_p3 = scmp.lt.s32.totalorder %s889_s20, %s889_s20 }
  0x2a   :  { %p896_p4 = por %p895_p3, %p894_p2 }
  0x2c   :  { %p897_p5 = pnand %p896_p4, %p890_p1 }
  0x2e   :  { %900 = shalt.err (!%p897_p5)
}
  0x2f   :  { %50 = dma.hbm_to_vmem [thread:$0]  %s1116_s2, 4096, %s45_s18, [#allocation6], %s954_s9, %s954_s9, %s955_s10  }
  0x30   :  { %s909_s23 = scalar_lea.vmem %s69_s19, 2048  ;;  %p914_p7 = scmp.lt.s32.totalorder %s69_s19, %s69_s19 }
  0x31   :  { %p910_p6 = scmp.ne.s32.totalorder %s69_s19, %s909_s23  ;;  %p915_p8 = scmp.lt.s32.totalorder %s909_s23, %s909_s23 }
  0x33   :  { %p916_p9 = por %p915_p8, %p914_p7 }
  0x35   :  { %p917_p10 = pnand %p916_p9, %p910_p6 }
  0x37   :  { %920 = shalt.err (!%p917_p10)
}
  0x38   :  { %74 = dma.hbm_to_vmem [thread:$0]  %s1118_s4, 2048, %s69_s19, [#allocation9], %s956_s13, %s956_s13, %s957_s14  }
  0x39   :  { %941 = dma.done.wait [#allocation3], 512  }
  0x3a   :  { %942 = vsyncadd [#allocation3], 4294966784 }
  0x3b   :  { %943 = dma.done.wait [#allocation6], 4352  }
  0x3c   :  { %944 = vsyncadd [#allocation6], 4294962944 }
  0x3d   :  { %945 = dma.done.wait [#allocation9], 6144  }
  0x3e   :  { %946 = vsyncadd [#allocation9], 4294961152  ;;  %v960_v0 = vmov 0.0   ;;  %v137_v1 = vld [vmem:[#allocation7 + $0xf8] sm:$0xff]  ;;  %v136_v2 = vld [vmem:[#allocation7 + $0xf0] sm:$0xff]  ;;  %vm961_vm0 = vmmov 0   ;;  %v227_v41 = vlaneseq }
  0x3f   :  { %202 = vmatprep.mubr.f32.mxu0 %v960_v0  ;;  %749 = vmatprep.subr.bf16.mxu1 %v960_v0  ;;  %v135_v3 = vld [vmem:[#allocation7 + $0xe8] sm:$0xff]  ;;  %v134_v4 = vld [vmem:[#allocation7 + $0xe0] sm:$0xff]  ;;  %v133_v5 = vld [vmem:[#allocation7 + $0xd8] sm:$0xff]  ;;  %vm250_vm1 = vcmask 130048  }
  0x40   :  { %138 = vmatprep.subr.mxu0 %v137_v1  ;;  %v132_v6 = vld [vmem:[#allocation7 + $0xd0] sm:$0xff]  ;;  %v131_v7 = vld [vmem:[#allocation7 + $0xc8] sm:$0xff]  ;;  %v130_v8 = vld [vmem:[#allocation7 + $0xc0] sm:$0xff]  ;;  %751 = vmatprep.mubr.msk.bf16.mxu1 %vm961_vm0, %v960_v0  ;;  %v1049_v42 = vshrl.u32 %v227_v41, 7 }
  0x41   :  { %139 = vmatpush1.msra.mxu0 %v136_v2  ;;  %v129_v9 = vld [vmem:[#allocation7 + $0xb8] sm:$0xff]  ;;  %v128_v10 = vld [vmem:[#allocation7 + $0xb0] sm:$0xff]  ;;  %v127_v11 = vld [vmem:[#allocation7 + $0xa8] sm:$0xff] }
  0x42   :  { %140 = vmatprep.subr.mxu0 %v135_v3  ;;  %v126_v12 = vld [vmem:[#allocation7 + $0xa0] sm:$0xff]  ;;  %v125_v13 = vld [vmem:[#allocation7 + $0x98] sm:$0xff]  ;;  %v124_v14 = vld [vmem:[#allocation7 + $0x90] sm:$0xff]  ;;  %v229_v43 = vsub.s32 1, %v1049_v42 }
  0x43   :  { %141 = vmatpush1.msra.mxu0 %v134_v4  ;;  %v123_v15 = vld [vmem:[#allocation7 + $0x88] sm:$0xff]  ;;  %v122_v16 = vld [vmem:[#allocation7 + $0x80] sm:$0xff]  ;;  %v121_v17 = vld [vmem:[#allocation7 + $0x78] sm:$0xff] }
  0x44   :  { %142 = vmatprep.subr.mxu0 %v133_v5  ;;  %v120_v18 = vld [vmem:[#allocation7 + $0x70] sm:$0xff]  ;;  %v119_v19 = vld [vmem:[#allocation7 + $0x68] sm:$0xff]  ;;  %v118_v20 = vld [vmem:[#allocation7 + $0x60] sm:$0xff] }
  0x45   :  { %143 = vmatpush1.msra.mxu0 %v132_v6  ;;  %v117_v21 = vld [vmem:[#allocation7 + $0x58] sm:$0xff]  ;;  %v116_v22 = vld [vmem:[#allocation7 + $0x50] sm:$0xff]  ;;  %v115_v23 = vld [vmem:[#allocation7 + $0x48] sm:$0xff] }
  0x46   :  { %144 = vmatprep.subr.mxu0 %v131_v7  ;;  %v114_v24 = vld [vmem:[#allocation7 + $0x40] sm:$0xff]  ;;  %v113_v25 = vld [vmem:[#allocation7 + $0x38] sm:$0xff]  ;;  %v112_v26 = vld [vmem:[#allocation7 + $0x30] sm:$0xff] }
  0x47   :  { %145 = vmatpush1.msra.mxu0 %v130_v8  ;;  %v111_v27 = vld [vmem:[#allocation7 + $0x28] sm:$0xff]  ;;  %v110_v28 = vld [vmem:[#allocation7 + $0x20] sm:$0xff]  ;;  %v109_v29 = vld [vmem:[#allocation7 + $0x18] sm:$0xff] }
  0x48   :  { %146 = vmatprep.subr.mxu0 %v129_v9  ;;  %v1021_v30 = vld [vmem:[#allocation2] sm:$0xff]  ;;  %v107_v32 = vld [vmem:[#allocation7 + $0x8] sm:$0xff]  ;;  %v106_v33 = vld [vmem:[#allocation7] sm:$0xff] }
  0x49   :  { %147 = vmatpush1.msra.mxu0 %v128_v10  ;;  %v108_v31 = vld [vmem:[#allocation7 + $0x10] sm:$0xff]  ;;  %v97_v34 = vmax.f32 %v1021_v30, 0.0  ;;  %v1024_v35 = vld [vmem:[#allocation2 + $0x8] sm:$0xff]  ;;  %v1031_v37 = vld [vmem:[#allocation2 + $0x10] sm:$0xff] }
  0x4a   :  { %148 = vmatprep.subr.mxu0 %v127_v11  ;;  %v98_v36 = vmax.f32 %v1024_v35, 0.0  ;;  %v99_v38 = vmax.f32 %v1031_v37, 0.0  ;;  %v1037_v39 = vld [vmem:[#allocation2 + $0x18] sm:$0xff]  ;;  %v1057_v45 = vld [vmem:[%s1119_s5] sm:$0xff]  ;;  %v383_v61 = vld [vmem:[#allocation8 + $0xf8] sm:$0xff]  ;;  %s962_s5 = smov [#allocation11]  }
  0x4b   :  { %149 = vmatpush1.msra.mxu0 %v126_v12  ;;  %v100_v40 = vmax.f32 %v1037_v39, 0.0  ;;  %v230_v47 = vrot.slane %v1057_v45, %v229_v43  ;;  %v1064_v55 = vld [vmem:[#allocation5] sm:$0xff]   ;;  %v1073_v62 = vld [vmem:[#allocation5 + $0x8] sm:$0xff]   ;;  %v381_v1 = vld [vmem:[#allocation8 + $0xe8] sm:$0xff]  ;;  %s695_s25 = sshll.u32 %s962_s5, 4  ;;  %s696_s25 = int_to_ptr.vmem [resolvable:$true] %s695_s25 }
  0x4c   :  { %150 = vmatprep.subr.mxu0 %v125_v13  ;;  %v382_v63 = vld [vmem:[#allocation8 + $0xf0] sm:$0xff]  ;;  %v380_v2 = vld [vmem:[#allocation8 + $0xe0] sm:$0xff]  ;;  %v379_v3 = vld [vmem:[#allocation8 + $0xd8] sm:$0xff]  ;;  %s921_s26 = scalar_lea.vmem %s696_s25, 512  ;;  %p926_p12 = scmp.lt.s32.totalorder %s696_s25, %s696_s25 }
  0x4d   :  { %151 = vmatpush1.msra.mxu0 %v124_v14  ;;  %v378_v4 = vld [vmem:[#allocation8 + $0xd0] sm:$0xff]  ;;  %v377_v5 = vld [vmem:[#allocation8 + $0xc8] sm:$0xff]  ;;  %v376_v6 = vld [vmem:[#allocation8 + $0xc0] sm:$0xff]  ;;  %p922_p11 = scmp.ne.s32.totalorder %s696_s25, %s921_s26  ;;  %p927_p13 = scmp.lt.s32.totalorder %s921_s26, %s921_s26 }
  0x4e   :  { %152 = vmatprep.subr.mxu0 %v123_v15  ;;  %v375_v7 = vld [vmem:[#allocation8 + $0xb8] sm:$0xff]  ;;  %v374_v8 = vld [vmem:[#allocation8 + $0xb0] sm:$0xff]  ;;  %v373_v9 = vld [vmem:[#allocation8 + $0xa8] sm:$0xff] }
  0x4f   :  { %153 = vmatpush1.msra.mxu0 %v122_v16  ;;  %v372_v10 = vld [vmem:[#allocation8 + $0xa0] sm:$0xff]  ;;  %v371_v11 = vld [vmem:[#allocation8 + $0x98] sm:$0xff]  ;;  %v370_v12 = vld [vmem:[#allocation8 + $0x90] sm:$0xff]  ;;  %p928_p0 = por %p927_p13, %p926_p12 }
  0x50   :  { %154 = vmatprep.subr.mxu0 %v121_v17  ;;  %v369_v13 = vld [vmem:[#allocation8 + $0x88] sm:$0xff]  ;;  %v368_v14 = vld [vmem:[#allocation8 + $0x80] sm:$0xff]  ;;  %v367_v15 = vld [vmem:[#allocation8 + $0x78] sm:$0xff] }
  0x51   :  { %155 = vmatpush1.msra.mxu0 %v120_v18  ;;  %v366_v16 = vld [vmem:[#allocation8 + $0x70] sm:$0xff]  ;;  %v365_v17 = vld [vmem:[#allocation8 + $0x68] sm:$0xff]  ;;  %v364_v18 = vld [vmem:[#allocation8 + $0x60] sm:$0xff]  ;;  %p929_p1 = pnand %p928_p0, %p922_p11 }
  0x52   :  { %156 = vmatprep.subr.mxu0 %v119_v19  ;;  %v363_v19 = vld [vmem:[#allocation8 + $0x58] sm:$0xff]  ;;  %v578_v30 = vld [vmem:[#allocation10 + $0x8] sm:$0xff] }
  0x53   :  { %157 = vmatpush1.msra.mxu0 %v118_v20  ;;  %v362_v20 = vld [vmem:[#allocation8 + $0x50] sm:$0xff] }
  0x54   :  { %158 = vmatprep.subr.mxu0 %v117_v21  ;;  %v361_v21 = vld [vmem:[#allocation8 + $0x48] sm:$0xff] }
  0x55   :  { %159 = vmatpush1.msra.mxu0 %v116_v22  ;;  %v360_v22 = vld [vmem:[#allocation8 + $0x40] sm:$0xff] }
  0x56   :  { %160 = vmatprep.subr.mxu0 %v115_v23  ;;  %v359_v23 = vld [vmem:[#allocation8 + $0x38] sm:$0xff] }
  0x57   :  { %161 = vmatpush1.msra.mxu0 %v114_v24  ;;  %v358_v24 = vld [vmem:[#allocation8 + $0x30] sm:$0xff] }
  0x58   :  { %162 = vmatprep.subr.mxu0 %v113_v25  ;;  %v357_v25 = vld [vmem:[#allocation8 + $0x28] sm:$0xff] }
  0x59   :  { %163 = vmatpush1.msra.mxu0 %v112_v26  ;;  %v356_v26 = vld [vmem:[#allocation8 + $0x20] sm:$0xff] }
  0x5a   :  { %164 = vmatprep.subr.mxu0 %v111_v27  ;;  %v355_v27 = vld [vmem:[#allocation8 + $0x18] sm:$0xff] }
  0x5b   :  { %165 = vmatpush1.msra.mxu0 %v110_v28  ;;  %v354_v28 = vld [vmem:[#allocation8 + $0x10] sm:$0xff] }
  0x5c   :  { %166 = vmatprep.subr.mxu0 %v109_v29  ;;  %v353_v29 = vld [vmem:[#allocation8 + $0x8] sm:$0xff] }
  0x5d   :  { %167 = vmatpush1.msra.mxu0 %v108_v31  ;;  %v352_v31 = vld [vmem:[#allocation8] sm:$0xff] }
  0x5e   :  { %168 = vmatprep.subr.mxu0 %v107_v32  ;;  %v592_v32 = vld [vmem:[#allocation10 + $0x78] sm:$0xff] }
  0x5f   :  { %169 = vmatpush1.msra.mxu0 %v106_v33  ;;  %v239_v33 = vsub.s32 0, %v1049_v42 }
  0x60   :  { %203 = vmatmul.mubr.f32.vlgmr.msra.gmra.mxu0 %v97_v34  ;;  %743 = vmatprep.subr.bf16.mxu0 %v960_v0 }
  0x61   :  { %208 = vmatprep.mubr.f32.mxu0 %v960_v0  ;;  %v240_v41 = vrot.slane %v1057_v45, %v239_v33 }
  0x64   :  { %209 = vmatmul.mubr.f32.gmra.mxu0 %v98_v36 }
  0x65   :  { %214 = vmatprep.mubr.f32.mxu0 %v960_v0 }
  0x68   :  { %215 = vmatmul.mubr.f32.gmra.mxu0 %v99_v38 }
  0x69   :  { %220 = vmatprep.mubr.f32.mxu0 %v960_v0 }
  0x6c   :  { %221 = vmatmul.mubr.f32.gmra.mxu0 %v100_v40 }
  0x6d   :  { %745 = vmatprep.mubr.msk.bf16.mxu0 %vm961_vm0, %v960_v0 }
 0x120   :  { %v1052_v44 = vpop.f32.mrf.mxu0 }
 0x121   :  { %v241_v43 = vadd.f32 %v240_v41, %v1052_v44 }
 0x122   :  { %v206_v46 = vpop.f32.mrf.mxu0 }
 0x123   :  { %v231_v50 = vadd.f32 %v230_v47, %v206_v46 }
 0x124   :  { %v1060_v48 = vpop.f32.mrf.mxu0 }
 0x126   :  { %v212_v49 = vpop.f32.mrf.mxu0 }
 0x127   :  { %v232_v51 = vadd.f32 %v230_v47, %v212_v49 }
 0x128   :  { %v1062_v52 = vpop.f32.mrf.mxu0 }
 0x129   :  { %v235_v53 = vpack.c.bf16 %v232_v51, %v231_v50  ;;  %v242_v50 = vadd.f32 %v240_v41, %v1060_v48 }
 0x12a   :  { %v218_v54 = vpop.f32.mrf.mxu0 }
 0x12b   :  { %744 = vmatpush3.bf16.msra.mxu0 %v235_v53  ;;  %v233_v58 = vadd.f32 %v230_v47, %v218_v54  ;;  %v591_v54 = vld [vmem:[#allocation10 + $0x70] sm:$0xff] }
 0x12c   :  { %v1066_v56 = vpop.f32.mrf.mxu0  ;;  %755 = vmatprep.subr.bf16.mxu0 %v960_v0 }
 0x12e   :  { %v224_v57 = vpop.f32.mrf.mxu0  ;;  %746 = vmatmul.mubr.msk.bf16.vlgmr.msra.gmra.mxu0 %vm250_vm1, %v1064_v55 }
 0x12f   :  { %v234_v59 = vadd.f32 %v230_v47, %v224_v57  ;;  %757 = vmatprep.mubr.msk.bf16.mxu0 %vm961_vm0, %v960_v0 }
 0x131   :  { %v236_v60 = vpack.c.bf16 %v234_v59, %v233_v58  ;;  %v590_v59 = vld [vmem:[#allocation10 + $0x68] sm:$0xff] }
 0x133   :  { %750 = vmatpush3.bf16.msra.mxu1 %v236_v60  ;;  %v243_v60 = vadd.f32 %v240_v41, %v1062_v52  ;;  %v587_v52 = vld [vmem:[#allocation10 + $0x50] sm:$0xff] }
 0x134   :  { %384 = vmatprep.subr.mxu1 %v383_v61 }
 0x136   :  { %752 = vmatmul.mubr.msk.bf16.vlgmr.msra.gmra.mxu1 %vm250_vm1, %v1073_v62 }
 0x137   :  { %385 = vmatpush1.msra.mxu1 %v382_v63  ;;  %448 = vmatprep.mubr.f32.mxu1 %v960_v0  ;;  %v589_v63 = vld [vmem:[#allocation10 + $0x60] sm:$0xff] }
 0x138   :  { %386 = vmatprep.subr.mxu1 %v381_v1 }
 0x139   :  { %387 = vmatpush1.msra.mxu1 %v380_v2  ;;  %v588_v2 = vld [vmem:[#allocation10 + $0x58] sm:$0xff] }
 0x13a   :  { %388 = vmatprep.subr.mxu1 %v379_v3  ;;  %v244_v3 = vadd.f32 %v240_v41, %v1066_v56  ;;  %v584_v56 = vld [vmem:[#allocation10 + $0x38] sm:$0xff] }
 0x13b   :  { %389 = vmatpush1.msra.mxu1 %v378_v4 }
 0x13c   :  { %390 = vmatprep.subr.mxu1 %v377_v5 }
 0x13d   :  { %391 = vmatpush1.msra.mxu1 %v376_v6 }
 0x13e   :  { %392 = vmatprep.subr.mxu1 %v375_v7 }
 0x13f   :  { %393 = vmatpush1.msra.mxu1 %v374_v8  ;;  %v586_v8 = vld [vmem:[#allocation10 + $0x48] sm:$0xff] }
 0x140   :  { %394 = vmatprep.subr.mxu1 %v373_v9 }
 0x141   :  { %395 = vmatpush1.msra.mxu1 %v372_v10  ;;  %v585_v10 = vld [vmem:[#allocation10 + $0x40] sm:$0xff] }
 0x142   :  { %396 = vmatprep.subr.mxu1 %v371_v11  ;;  %v583_v11 = vld [vmem:[#allocation10 + $0x30] sm:$0xff] }
 0x143   :  { %397 = vmatpush1.msra.mxu1 %v370_v12  ;;  %v582_v12 = vld [vmem:[#allocation10 + $0x28] sm:$0xff] }
 0x144   :  { %398 = vmatprep.subr.mxu1 %v369_v13  ;;  %v581_v13 = vld [vmem:[#allocation10 + $0x20] sm:$0xff] }
 0x145   :  { %399 = vmatpush1.msra.mxu1 %v368_v14  ;;  %v580_v14 = vld [vmem:[#allocation10 + $0x18] sm:$0xff] }
 0x146   :  { %400 = vmatprep.subr.mxu1 %v367_v15  ;;  %v579_v15 = vld [vmem:[#allocation10 + $0x10] sm:$0xff] }
 0x147   :  { %401 = vmatpush1.msra.mxu1 %v366_v16  ;;  %v475_v16 = vsub.s32 3, %v1049_v42 }
 0x148   :  { %402 = vmatprep.subr.mxu1 %v365_v17 }
 0x149   :  { %403 = vmatpush1.msra.mxu1 %v364_v18 }
 0x14a   :  { %404 = vmatprep.subr.mxu1 %v363_v19  ;;  %v476_v19 = vrot.slane %v1057_v45, %v475_v16 }
 0x14b   :  { %405 = vmatpush1.msra.mxu1 %v362_v20 }
 0x14c   :  { %406 = vmatprep.subr.mxu1 %v361_v21 }
 0x14d   :  { %407 = vmatpush1.msra.mxu1 %v360_v22 }
 0x14e   :  { %408 = vmatprep.subr.mxu1 %v359_v23 }
 0x14f   :  { %409 = vmatpush1.msra.mxu1 %v358_v24 }
 0x150   :  { %410 = vmatprep.subr.mxu1 %v357_v25 }
 0x151   :  { %411 = vmatpush1.msra.mxu1 %v356_v26  ;;  %v485_v26 = vsub.s32 2, %v1049_v42 }
 0x152   :  { %412 = vmatprep.subr.mxu1 %v355_v27  ;;  %v595_v27 = vsub.s32 4, %v1049_v42 }
 0x153   :  { %413 = vmatpush1.msra.mxu1 %v354_v28 }
 0x154   :  { %414 = vmatprep.subr.mxu1 %v353_v29  ;;  %v486_v29 = vrot.slane %v1057_v45, %v485_v26 }
 0x155   :  { %415 = vmatpush1.msra.mxu1 %v352_v31  ;;  %v596_v31 = vrot.slane %v1057_v45, %v595_v27 }
 0x156   :  { %767 = vmatprep.subr.mxu1 %v592_v32 }
 0x1ee   :  { %v288_v46 = vpop.f32.mrf.mxu0 }
 0x1ef   :  { %v344_v47 = vadd.f32 %v288_v46, %v241_v43 }
 0x1f0   :  { %v747_v49 = vpop.f32.mrf.mxu0 }
 0x1f1   :  { %v348_v51 = vmax.f32 %v344_v47, 0.0 }
 0x1f2   :  { %v291_v53 = vpop.f32.mrf.mxu0 }
 0x1f3   :  { %v345_v57 = vadd.f32 %v291_v53, %v242_v50  ;;  %449 = vmatmul.mubr.f32.vlgmr.msra.gmra.mxu1 %v348_v51 }
 0x1f4   :  { %v748_v58 = vpop.f32.mrf.mxu0  ;;  %454 = vmatprep.mubr.f32.mxu1 %v960_v0  ;;  %768 = vmatpush3.msra.mxu1 %v592_v32 }
 0x1f5   :  { %v349_v61 = vmax.f32 %v345_v57, 0.0  ;;  %769 = vmatprep.subr.mxu1 %v591_v54 }
 0x1f6   :  { %v337_v44 = vpop.f32.mrf.mxu1  ;;  %770 = vmatpush3.msra.mxu1 %v591_v54 }
 0x1f7   :  { %v346_v1 = vadd.f32 %v337_v44, %v243_v60  ;;  %455 = vmatmul.mubr.f32.gmra.mxu1 %v349_v61  ;;  %771 = vmatprep.subr.mxu1 %v590_v59 }
 0x1f8   :  { %v753_v48 = vpop.f32.mrf.mxu1  ;;  %460 = vmatprep.mubr.f32.mxu1 %v960_v0  ;;  %772 = vmatpush3.msra.mxu1 %v590_v59 }
 0x1f9   :  { %v350_v4 = vmax.f32 %v346_v1, 0.0  ;;  %773 = vmatprep.subr.mxu1 %v589_v63 }
 0x1fa   :  { %v340_v5 = vpop.f32.mrf.mxu1  ;;  %774 = vmatpush3.msra.mxu1 %v589_v63 }
 0x1fb   :  { %v347_v6 = vadd.f32 %v340_v5, %v244_v3  ;;  %461 = vmatmul.mubr.f32.gmra.mxu1 %v350_v4  ;;  %775 = vmatprep.subr.mxu1 %v588_v2 }
 0x1fc   :  { %v754_v7 = vpop.f32.mrf.mxu1  ;;  %466 = vmatprep.mubr.f32.mxu1 %v960_v0  ;;  %776 = vmatpush3.msra.mxu1 %v588_v2 }
 0x1fd   :  { %v351_v9 = vmax.f32 %v347_v6, 0.0  ;;  %777 = vmatprep.subr.mxu1 %v587_v52 }
 0x1fe   :  { %778 = vmatpush3.msra.mxu1 %v587_v52 }
 0x1ff   :  { %467 = vmatmul.mubr.f32.gmra.mxu1 %v351_v9  ;;  %779 = vmatprep.subr.mxu1 %v586_v8 }
 0x200   :  { %780 = vmatpush3.msra.mxu1 %v586_v8  ;;  %799 = vmatprep.mubr.f32.mxu1 %v97_v34  ;;  %v577_v34 = vld [vmem:[#allocation10] sm:$0xff] }
 0x201   :  { %781 = vmatprep.subr.mxu1 %v585_v10 }
 0x202   :  { %782 = vmatpush3.msra.mxu1 %v585_v10 }
 0x203   :  { %783 = vmatprep.subr.mxu1 %v584_v56 }
 0x204   :  { %784 = vmatpush3.msra.mxu1 %v584_v56 }
 0x205   :  { %785 = vmatprep.subr.mxu1 %v583_v11 }
 0x206   :  { %786 = vmatpush3.msra.mxu1 %v583_v11 }
 0x207   :  { %787 = vmatprep.subr.mxu1 %v582_v12 }
 0x208   :  { %788 = vmatpush3.msra.mxu1 %v582_v12 }
 0x209   :  { %789 = vmatprep.subr.mxu1 %v581_v13 }
 0x20a   :  { %790 = vmatpush3.msra.mxu1 %v581_v13 }
 0x20b   :  { %791 = vmatprep.subr.mxu1 %v580_v14 }
 0x20c   :  { %792 = vmatpush3.msra.mxu1 %v580_v14 }
 0x20d   :  { %793 = vmatprep.subr.mxu1 %v579_v15 }
 0x20e   :  { %794 = vmatpush3.msra.mxu1 %v579_v15 }
 0x20f   :  { %795 = vmatprep.subr.mxu1 %v578_v30 }
 0x210   :  { %796 = vmatpush3.msra.mxu1 %v578_v30 }
 0x211   :  { %797 = vmatprep.subr.mxu1 %v577_v34 }
 0x212   :  { %798 = vmatpush3.msra.mxu1 %v577_v34 }
 0x213   :  { %800 = vmatmul.mubr.f32.vlgmr.msra.gmra.mxu1 %v98_v36 }
 0x214   :  { %802 = vmatprep.mubr.f32.mxu1 %v99_v38 }
 0x217   :  { %803 = vmatmul.mubr.f32.gmra.mxu1 %v100_v40 }
 0x2b3   :  { %v450_v17 = vpop.f32.mrf.mxu1 }
 0x2b4   :  { %v487_v32 = vadd.f32 %v486_v29, %v450_v17 }
 0x2b5   :  { %v452_v18 = vpop.f32.mrf.mxu1 }
 0x2b6   :  { %v477_v22 = vadd.f32 %v476_v19, %v452_v18 }
 0x2b7   :  { %v456_v20 = vpop.f32.mrf.mxu1 }
 0x2b8   :  { %v488_v47 = vadd.f32 %v486_v29, %v456_v20 }
 0x2b9   :  { %v458_v21 = vpop.f32.mrf.mxu1 }
 0x2ba   :  { %v478_v23 = vadd.f32 %v476_v19, %v458_v21 }
 0x2bb   :  { %v462_v24 = vpop.f32.mrf.mxu1 }
 0x2bc   :  { %v481_v25 = vpack.c.bf16 %v478_v23, %v477_v22  ;;  %v489_v54 = vadd.f32 %v486_v29, %v462_v24 }
 0x2bd   :  { %v464_v35 = vpop.f32.mrf.mxu1 }
 0x2be   :  { %756 = vmatpush3.bf16.msra.mxu0 %v481_v25  ;;  %v479_v38 = vadd.f32 %v476_v19, %v464_v35 }
 0x2bf   :  { %v468_v36 = vpop.f32.mrf.mxu1  ;;  %761 = vmatprep.subr.bf16.mxu0 %v960_v0 }
 0x2c0   :  { %v490_v61 = vadd.f32 %v486_v29, %v468_v36 }
 0x2c1   :  { %v470_v37 = vpop.f32.mrf.mxu1  ;;  %758 = vmatmul.mubr.msk.bf16.vlgmr.msra.gmra.mxu0 %vm250_vm1, %v1064_v55 }
 0x2c2   :  { %v480_v39 = vadd.f32 %v476_v19, %v470_v37  ;;  %763 = vmatprep.mubr.msk.bf16.mxu0 %vm961_vm0, %v960_v0 }
 0x2c4   :  { %v482_v40 = vpack.c.bf16 %v480_v39, %v479_v38 }
 0x2c6   :  { %762 = vmatpush3.bf16.msra.mxu0 %v482_v40 }
 0x2c9   :  { %764 = vmatmul.mubr.msk.bf16.vlgmr.msra.gmra.mxu0 %vm250_vm1, %v1073_v62 }
 0x2d3   :  { %v801_v28 = vpop.f32.mrf.mxu1 }
 0x2d4   :  { %v669_v49 = vadd.f32 %v801_v28, %v596_v31 }
 0x2d5   :  { %v663_v55 = vpop.f32.mrf.mxu1 }
 0x2d6   :  { %v664_v33 = vadd.f32 %v663_v55, %v596_v31 }
 0x2d7   :  { %v804_v43 = vpop.f32.mrf.mxu1 }
 0x2d8   :  { %v679_v1 = vadd.f32 %v804_v43, %v596_v31 }
 0x2d9   :  { %v673_v51 = vpop.f32.mrf.mxu1 }
 0x2da   :  { %v674_v58 = vadd.f32 %v673_v51, %v596_v31 }
 0x381   :  { %v525_v41 = vpop.f32.mrf.mxu0 }
 0x382   :  { %v573_v0 = vadd.f32 %v525_v41, %v487_v32 }
 0x383   :  { %v759_v46 = vpop.f32.mrf.mxu0 }
 0x384   :  { %v682_v50 = vadd.f32 %v664_v33, %v573_v0 }
 0x385   :  { %v528_v62 = vpop.f32.mrf.mxu0 }
 0x386   :  { %686 = vst [vmem:[#allocation11] sm:$0xff] %v682_v50  ;;  %v574_v53 = vadd.f32 %v528_v62, %v488_v47 }
 0x387   :  { %v760_v42 = vpop.f32.mrf.mxu0 }
 0x388   :  { %v683_v57 = vadd.f32 %v669_v49, %v574_v53 }
 0x389   :  { %v566_v59 = vpop.f32.mrf.mxu0 }
 0x38a   :  { %687 = vst [vmem:[#allocation11 + $0x8] sm:$0xff] %v683_v57  ;;  %v575_v45 = vadd.f32 %v566_v59, %v489_v54 }
 0x38b   :  { %v765_v60 = vpop.f32.mrf.mxu0 }
 0x38c   :  { %v684_v44 = vadd.f32 %v674_v58, %v575_v45 }
 0x38d   :  { %v569_v63 = vpop.f32.mrf.mxu0 }
 0x38e   :  { %688 = vst [vmem:[#allocation11 + $0x10] sm:$0xff] %v684_v44  ;;  %v576_v48 = vadd.f32 %v569_v63, %v490_v61 }
 0x38f   :  { %v766_v2 = vpop.f32.mrf.mxu0 }
 0x390   :  { %v685_v3 = vadd.f32 %v679_v1, %v576_v48 }
 0x392   :  { %689 = vst [vmem:[#allocation11 + $0x18] sm:$0xff] %v685_v3 }
 0x393   :  { %932 = shalt.err (!%p929_p1)
}
 0x394   :  { %701 = dma.vmem_to_hbm [thread:$0]  %s696_s25, 512, %s1120_s6, [#allocation4], %s956_s13, %s956_s13, %s957_s14  }
 0x395   :  { %947 = dma.done.wait [#allocation4], 512  }
 0x396   :  { %948 = vsyncadd [#allocation4], 4294966784 }
 0x397   :  { %705 = vsyncpa [#allocation3], 1 }
 0x398   :  { %706 = vsyncpa [#allocation6], 1 }
 0x399   :  { %707 = vsyncpa [#allocation9], 1 }
 0x39a   :  { %708 = vsyncpa [#allocation4], 1 }

</bundles_post_ra>
